<compile_context>
chip_gen: v7x
topology: tpu7x:2x2x1
jax: 0.10.0
libtpu: 0.0.40
codegen_flags: <defaults>
</compile_context>

<pallas_src>
import jax
import jax.numpy as jnp
import numpy as np
from jax.experimental import pallas as pl
from jax.experimental.pallas import tpu as pltpu


def _make_kernel(field_dims, offsets, tb, cb):
    """Build the FFM-linear kernel with field dims/offsets baked in as constants."""
    n_chunks = tb // cb
    assert n_chunks * cb == tb

    def kernel(idx_ref, emb_ref, bias_ref, out_ref):
        # idx_ref : (F, tb) int32  raw per-field indices, batch on the lane axis
        # emb_ref : (V, 1)  f32    embedding table column (output_dim == 1), resident
        # bias_ref: (1,)    f32    bias scalar in SMEM
        # out_ref : (1, tb) f32    lane-dense output row
        bias = bias_ref[0]
        emb = emb_ref[...]                                    # (V, 1)

        # Hoisted once per tile: per-field embedding slices, lane-broadcast to
        # the chunk width (JAX does not CSE broadcast_in_dim inside loops).
        emb_b = [
            jnp.broadcast_to(emb[off:off + dim, :], (dim, cb))
            for off, dim in zip(offsets, field_dims)
        ]

        # Static lane-chunk loop: each chunk ends with a store, so its
        # intermediates die before the next chunk (bounded vreg pressure).
        for c in range(n_chunks):
            c0 = c * cb
            total = jnp.zeros((1, cb), jnp.float32)
            for f, dim in enumerate(field_dims):
                idx_f = idx_ref[f:f + 1, c0:c0 + cb]                       # (1, cb)
                row = jax.lax.broadcasted_iota(jnp.int32, (dim, cb), 0)    # (dim, cb)
                hit = row == idx_f                                         # sublane bcast
                # Disjoint field ranges -> exactly one hit per lane per field.
                total = total + jnp.sum(jnp.where(hit, emb_b[f], 0.0),
                                        axis=0, keepdims=True)            # (1, cb)
            out_ref[:, c0:c0 + cb] = total + bias                          # lane-dense store

    return kernel


def features_linear(x_idx, field_dims, emb_weight, bias, tile_b=2048):
    """FeaturesLinear forward.

    x_idx      : (B, F) int32 per-field raw indices (each in [0, field_dims[f]))
    field_dims : static tuple of per-field vocab sizes (sum == V)
    emb_weight : (V, 1) f32   embedding table (output_dim == 1)
    bias       : (1,)   f32
    returns    : (B, 1) f32
    """
    field_dims = tuple(int(d) for d in field_dims)
    offsets = tuple(int(o) for o in
                    np.concatenate(([0], np.cumsum(field_dims)[:-1])).astype(np.int64))

    B, F = x_idx.shape
    V, D = emb_weight.shape
    assert F == len(field_dims)
    assert V == sum(field_dims)
    assert D == 1, "kernel specialised to output_dim == 1 (module default)"

    # Batch tiling: large lane-dense tiles once B is big; single full tile otherwise.
    tb = min(B, tile_b)
    n_tiles = pl.cdiv(B, tb)
    Bp = n_tiles * tb
    if Bp != B:
        # Padded rows use raw index 0 (valid); their outputs are discarded below.
        x_idx = jnp.pad(x_idx, ((0, Bp - B), (0, 0)))

    # Inner lane-chunk width inside a tile (bounds vreg pressure).
    cb = 512 if (tb > 512 and tb % 512 == 0) else tb

    idx_t = x_idx.T.astype(jnp.int32)                         # (F, Bp)  batch on lanes
    emb_f32 = emb_weight.astype(jnp.float32)
    bias1d = bias.reshape(1).astype(jnp.float32)

    # Generation-aware VMEM limit: double-buffered idx/out blocks + the
    # lane-padded resident embedding column, clamped to 75% of physical VMEM
    # (respects v7x's 64 MiB per-TC capacity).
    try:
        vmem_cap = int(pltpu.get_tpu_info().vmem_capacity_bytes)
    except Exception:
        vmem_cap = 64 * 1024 * 1024
    v_sub = ((V + 7) // 8) * 8
    est = (2 * F * tb * 4            # double-buffered index blocks
           + 2 * tb * 4              # double-buffered output blocks
           + 2 * v_sub * 128 * 4     # resident emb column, lane-padded
           + (1 << 20))              # slack
    vmem_limit = int(min(max(4 * est, 8 << 20), (vmem_cap * 3) // 4))

    out_row = pl.pallas_call(
        _make_kernel(field_dims, offsets, tb, cb),
        out_shape=jax.ShapeDtypeStruct((1, Bp), jnp.float32),
        grid_spec=pltpu.PrefetchScalarGridSpec(
            num_scalar_prefetch=0,
            grid=(n_tiles,),
            in_specs=[
                pl.BlockSpec((F, tb), lambda i: (0, i)),                 # per-tile indices (pipelined)
                pl.BlockSpec((V, 1), lambda i: (0, 0)),                  # emb column, resident
                pl.BlockSpec(memory_space=pltpu.MemorySpace.SMEM),       # bias scalar in SMEM
            ],
            out_specs=pl.BlockSpec((1, tb), lambda i: (0, i)),           # lane-dense output
        ),
        compiler_params=pltpu.CompilerParams(
            dimension_semantics=("parallel",),
            vmem_limit_bytes=vmem_limit,
        ),
    )(idx_t, emb_f32, bias1d)

    # Layout plumbing back to the module's (B, output_dim) shape.
    return out_row[:, :B].reshape(B, 1)


def _reference(x_idx, offsets, emb_weight, bias):
    return (jnp.sum(jnp.take(emb_weight, x_idx + offsets[None, :], axis=0), axis=1)
            + bias[None, :])


if __name__ == "__main__":
    # Module config (synthetic, deterministic init).
    field_dims = (3, 5, 7, 9)                 # sum = 24 embedding rows
    output_dim = 1
    num_fields = len(field_dims)
    vocab = int(sum(field_dims))

    key = jax.random.PRNGKey(0)
    k_emb, k_small, k_big = jax.random.split(key, 3)

    # Parameters: Embedding weight deterministic; bias init uniform(0,0) == zeros.
    emb_weight = jax.random.normal(k_emb, (vocab, output_dim), dtype=jnp.float32)
    bias = jnp.zeros((output_dim,), dtype=jnp.float32)

    offsets_np = np.array((0, *np.cumsum(field_dims)[:-1]), dtype=np.int32)
    offsets = jnp.asarray(offsets_np)

    def make_inputs(k, batch):
        ks = jax.random.split(k, num_fields)
        cols = [jax.random.randint(ks[f], (batch, 1), 0, field_dims[f], dtype=jnp.int32)
                for f in range(num_fields)]
        return jnp.concatenate(cols, axis=1)              # (batch, num_fields)

    # 1) Small batch (single full-extent tile, single chunk).
    x_small = make_inputs(k_small, 8)
    out_small = jax.block_until_ready(features_linear(x_small, field_dims, emb_weight, bias))
    ref_small = _reference(x_small, offsets, emb_weight, bias)
    np.testing.assert_allclose(np.asarray(out_small), np.asarray(ref_small),
                               rtol=1e-6, atol=1e-6)

    # 2) Larger batch exercising multi-tile grid, inner lane-chunk loop and padding.
    x_big = make_inputs(k_big, 2600)
    out_big = jax.block_until_ready(
        features_linear(x_big, field_dims, emb_weight, bias, tile_b=1024))
    ref_big = _reference(x_big, offsets, emb_weight, bias)
    np.testing.assert_allclose(np.asarray(out_big), np.asarray(ref_big),
                               rtol=1e-6, atol=1e-6)

    print("KERNEL_OK")
</pallas_src>

<mosaic_0001>
module attributes {stable_mosaic.version = 11 : i64} {
  func.func @kernel(%arg0: i32, %arg1: memref<4x8xi32, #tpu.memory_space<vmem>>, %arg2: memref<24x1xf32, #tpu.memory_space<vmem>>, %arg3: memref<1xf32, #tpu.memory_space<smem>>, %arg4: memref<1x8xf32, #tpu.memory_space<vmem>>) attributes {dimension_semantics = [#tpu.dimension_semantics<parallel>], iteration_bounds = array<i64: 1>, scalar_prefetch = 0 : i64, scratch_operands = 0 : i64, tpu.core_type = #tpu.core_type<tc>, window_params = [{transform_indices = @transform_0, window_bounds = array<i64: 4, 8>}, {pipeline_mode = #tpu.pipeline_mode<synchronous>, transform_indices = @transform_1, window_bounds = array<i64: 24, 1>}, {transform_indices = @transform_2, window_bounds = array<i64: 1>}, {transform_indices = @transform_3, window_bounds = array<i64: 1, 8>}]} {
    %c0 = arith.constant 0 : index
    %0 = memref.load %arg3[%c0] : memref<1xf32, #tpu.memory_space<smem>>
    %c0_0 = arith.constant 0 : index
    %c0_1 = arith.constant 0 : index
    %1 = vector.load %arg2[%c0_0, %c0_1] : memref<24x1xf32, #tpu.memory_space<vmem>>, vector<24x1xf32>
    %2 = vector.extract_strided_slice %1 {offsets = [0, 0], sizes = [3, 1], strides = [1, 1]} : vector<24x1xf32> to vector<3x1xf32>
    %3 = vector.shape_cast %2 : vector<3x1xf32> to vector<3x1xf32>
    %4 = vector.broadcast %3 : vector<3x1xf32> to vector<3x8xf32>
    %5 = vector.extract_strided_slice %1 {offsets = [3, 0], sizes = [5, 1], strides = [1, 1]} : vector<24x1xf32> to vector<5x1xf32>
    %6 = vector.shape_cast %5 : vector<5x1xf32> to vector<5x1xf32>
    %7 = vector.broadcast %6 : vector<5x1xf32> to vector<5x8xf32>
    %8 = vector.extract_strided_slice %1 {offsets = [8, 0], sizes = [7, 1], strides = [1, 1]} : vector<24x1xf32> to vector<7x1xf32>
    %9 = vector.shape_cast %8 : vector<7x1xf32> to vector<7x1xf32>
    %10 = vector.broadcast %9 : vector<7x1xf32> to vector<7x8xf32>
    %11 = vector.extract_strided_slice %1 {offsets = [15, 0], sizes = [9, 1], strides = [1, 1]} : vector<24x1xf32> to vector<9x1xf32>
    %12 = vector.shape_cast %11 : vector<9x1xf32> to vector<9x1xf32>
    %13 = vector.broadcast %12 : vector<9x1xf32> to vector<9x8xf32>
    %cst = arith.constant 0.000000e+00 : f32
    %14 = vector.broadcast %cst : f32 to vector<1x8xf32>
    %c0_2 = arith.constant 0 : index
    %c0_3 = arith.constant 0 : index
    %15 = vector.load %arg1[%c0_2, %c0_3] : memref<4x8xi32, #tpu.memory_space<vmem>>, vector<1x8xi32>
    %16 = tpu.iota {dimensions = array<i32: 0>} : vector<3x8xi32>
    %17 = vector.broadcast %15 : vector<1x8xi32> to vector<3x8xi32>
    %18 = arith.cmpi eq, %16, %17 : vector<3x8xi32>
    %cst_4 = arith.constant 0.000000e+00 : f32
    %19 = vector.broadcast %cst_4 : f32 to vector<3x8xf32>
    %20 = arith.select %18, %4, %19 : vector<3x8xi1>, vector<3x8xf32>
    %cst_5 = arith.constant dense<0.000000e+00> : vector<8xf32>
    %21 = vector.multi_reduction <add>, %20, %cst_5 [0] : vector<3x8xf32> to vector<8xf32>
    %22 = vector.shape_cast %21 : vector<8xf32> to vector<1x8xf32>
    %23 = arith.addf %14, %22 : vector<1x8xf32>
    %c1 = arith.constant 1 : index
    %c0_6 = arith.constant 0 : index
    %24 = vector.load %arg1[%c1, %c0_6] : memref<4x8xi32, #tpu.memory_space<vmem>>, vector<1x8xi32>
    %25 = tpu.iota {dimensions = array<i32: 0>} : vector<5x8xi32>
    %26 = vector.broadcast %24 : vector<1x8xi32> to vector<5x8xi32>
    %27 = arith.cmpi eq, %25, %26 : vector<5x8xi32>
    %cst_7 = arith.constant 0.000000e+00 : f32
    %28 = vector.broadcast %cst_7 : f32 to vector<5x8xf32>
    %29 = arith.select %27, %7, %28 : vector<5x8xi1>, vector<5x8xf32>
    %cst_8 = arith.constant dense<0.000000e+00> : vector<8xf32>
    %30 = vector.multi_reduction <add>, %29, %cst_8 [0] : vector<5x8xf32> to vector<8xf32>
    %31 = vector.shape_cast %30 : vector<8xf32> to vector<1x8xf32>
    %32 = arith.addf %23, %31 : vector<1x8xf32>
    %c2 = arith.constant 2 : index
    %c0_9 = arith.constant 0 : index
    %33 = vector.load %arg1[%c2, %c0_9] : memref<4x8xi32, #tpu.memory_space<vmem>>, vector<1x8xi32>
    %34 = tpu.iota {dimensions = array<i32: 0>} : vector<7x8xi32>
    %35 = vector.broadcast %33 : vector<1x8xi32> to vector<7x8xi32>
    %36 = arith.cmpi eq, %34, %35 : vector<7x8xi32>
    %cst_10 = arith.constant 0.000000e+00 : f32
    %37 = vector.broadcast %cst_10 : f32 to vector<7x8xf32>
    %38 = arith.select %36, %10, %37 : vector<7x8xi1>, vector<7x8xf32>
    %cst_11 = arith.constant dense<0.000000e+00> : vector<8xf32>
    %39 = vector.multi_reduction <add>, %38, %cst_11 [0] : vector<7x8xf32> to vector<8xf32>
    %40 = vector.shape_cast %39 : vector<8xf32> to vector<1x8xf32>
    %41 = arith.addf %32, %40 : vector<1x8xf32>
    %c3 = arith.constant 3 : index
    %c0_12 = arith.constant 0 : index
    %42 = vector.load %arg1[%c3, %c0_12] : memref<4x8xi32, #tpu.memory_space<vmem>>, vector<1x8xi32>
    %43 = tpu.iota {dimensions = array<i32: 0>} : vector<9x8xi32>
    %44 = vector.broadcast %42 : vector<1x8xi32> to vector<9x8xi32>
    %45 = arith.cmpi eq, %43, %44 : vector<9x8xi32>
    %cst_13 = arith.constant 0.000000e+00 : f32
    %46 = vector.broadcast %cst_13 : f32 to vector<9x8xf32>
    %47 = arith.select %45, %13, %46 : vector<9x8xi1>, vector<9x8xf32>
    %cst_14 = arith.constant dense<0.000000e+00> : vector<8xf32>
    %48 = vector.multi_reduction <add>, %47, %cst_14 [0] : vector<9x8xf32> to vector<8xf32>
    %49 = vector.shape_cast %48 : vector<8xf32> to vector<1x8xf32>
    %50 = arith.addf %41, %49 : vector<1x8xf32>
    %51 = vector.broadcast %0 : f32 to vector<1x8xf32>
    %52 = arith.addf %50, %51 : vector<1x8xf32>
    %c0_15 = arith.constant 0 : index
    %c0_16 = arith.constant 0 : index
    %53 = vector.load %arg4[%c0_15, %c0_16] : memref<1x8xf32, #tpu.memory_space<vmem>>, vector<1x8xf32>
    tpu.vector_store %arg4[%c0_15, %c0_16], %52 {strides = array<i32>} : memref<1x8xf32, #tpu.memory_space<vmem>>, vector<1x8xf32>,
    return
  }
  func.func @transform_0(%arg0: i32) -> (i32, i32) {
    %c0_i32 = arith.constant 0 : i32
    %c0_i32_0 = arith.constant 0 : i32
    return %c0_i32, %arg0 : i32, i32
  }
  func.func @transform_1(%arg0: i32) -> (i32, i32) {
    %c0_i32 = arith.constant 0 : i32
    %c0_i32_0 = arith.constant 0 : i32
    %c0_i32_1 = arith.constant 0 : i32
    return %c0_i32, %c0_i32_0 : i32, i32
  }
  func.func @transform_2(%arg0: i32) -> i32 {
    %c0_i32 = arith.constant 0 : i32
    %c0_i32_0 = arith.constant 0 : i32
    return %c0_i32 : i32
  }
  func.func @transform_3(%arg0: i32) -> (i32, i32) {
    %c0_i32 = arith.constant 0 : i32
    %c0_i32_0 = arith.constant 0 : i32
    return %c0_i32, %arg0 : i32, i32
  }
}

</mosaic_0001>

<bundles_post_ra>
// kernel: tpu_custom_call.1
= control target key start
LH: loop header
LB: loop body
LE: loop exit
PB: predicated region body
PF: predicated region fallthrough
CT: control target
= control target key end

     0   :  { %v163_v2 = vmov 0   ;;  %s223_s0 = inlined_call_operand.vmem [shape: s32[4,8], index: 0, kind: input, shape index: {}]   ;;  %s224_s1 = inlined_call_operand.vmem [shape: f32[24,1], index: 1, kind: input, shape index: {}]   ;;  %s225_s2 = inlined_call_operand.<no memory space> [shape: f32[1], index: 2, kind: input, shape index: {}]   ;;  %s226_s3 = inlined_call_operand.hbm [shape: f32[1,8], index: 3, kind: output, shape index: {}]  }
   0x1   :  { %v17_v0 = vld [vmem:[%s224_s1] sm:$0xff]  ;;  %v19_v1 = vld [vmem:[%s224_s1 + $0x10] sm:$0xff]  ;;  %137 = vset.pattern.permute.xlu0 %v163_v2  ;;  %138 = vset.pattern.permute.xlu1 %v163_v2 }
   0x2   :  { %9 = vsyncpa [#allocation4], 0  ;;  %22 = vperm.xlu0 %137, %v17_v0   ;;  %32 = vperm.xlu1 %138, %v19_v1   ;;  %v18_v3 = vld [vmem:[%s224_s1 + $0x8] sm:$0xff]  ;;  %v35_v4 = vlaneseq  ;;  %v131_v6 = vld [vmem:[%s223_s0] ss:$0 sm:$0xff]  ;;  %vm43_vm1 = vcmask 59392   ;;  %v114_v55 = vstv %s225_s2 }
   0x3   :  { %v132_v8 = vld [vmem:[%s223_s0 + $0x1] ss:$0 sm:$0xff]  ;;  %v134_v9 = vld [vmem:[%s223_s0 + $0x3] ss:$0 sm:$0xff]  ;;  %v133_v10 = vld [vmem:[%s223_s0 + $0x2] ss:$0 sm:$0xff] }
   0x4   :  { %v36_v5 = vshrl.u32 %v35_v4, 7  ;;  %vm61_vm4 = vcmask 61440   ;;  %vm77_vm6 = vcmask 63488   ;;  %vm104_vm7 = vcmask 57344   ;;  %s164_s26 = smov [#allocation3]  }
   0x5   :  { %vm94_vm9 = vcmask 1040384   ;;  %vm102_vm10 = vcmask 64512   ;;  %s123_s27 = sshll.u32 %s164_s26, 4  ;;  %s124_s27 = int_to_ptr.vmem [resolvable:$true] %s123_s27 }
   0x6   :  { %27 = vperm.xlu0 %137, %v18_v3   ;;  %v87_v7 = vadd.s32 8, %v36_v5  ;;  %vm41_vm0 = vcmp.eq.s32.totalorder %v36_v5, %v131_v6  ;;  %vm57_vm2 = vcmp.eq.s32.totalorder %v36_v5, %v132_v8  ;;  %vm75_vm5 = vcmp.eq.s32.totalorder %v36_v5, %v133_v10  ;;  %s139_s28 = scalar_lea.vmem %s124_s27, 16  ;;  %s143_s29 = scalar_lea.vmem %s124_s27, 32 }
   0x7   :  { %vm92_vm8 = vcmp.eq.s32.totalorder %v36_v5, %v134_v9  ;;  %p140_p0 = scmp.ne.s32.totalorder %s124_s27, %s139_s28  ;;  %p144_p1 = scmp.lt.s32.totalorder %s124_s27, %s124_s27 }
   0x8   :  { %vm93_vm3 = vcmp.eq.s32.totalorder %v87_v7, %v134_v9  ;;  %p145_p2 = scmp.lt.s32.totalorder %s143_s29, %s139_s28 }
   0xa   :  { %p146_p3 = por %p145_p2, %p144_p1 }
   0xc   :  { %p147_p4 = pnand %p146_p3, %p140_p0 }
  0x81   :  { %v23_v11 = vpop.permute.xlu0 %22  ;;  %v33_v12 = vpop.permute.xlu1 %32 }
  0x82   :  { %v42_v13 = vsel %vm41_vm0, %v23_v11, 0.0  ;;  %v58_v14 = vrot.slane %v23_v11, 3  ;;  %v96_v15 = vrot.slane %v33_v12, 7 }
  0x83   :  { %v44_v16 = vsel %vm43_vm1, %v42_v13, 0.0 }
  0x84   :  { %v45_v17 = vrot.slane %v44_v16, 4  ;;  %v60_v18 = vsel %vm57_vm2, %v58_v14, 0.0  ;;  %v101_v19 = vsel %vm93_vm3, %v96_v15, 0.0 }
  0x85   :  { %v62_v20 = vsel %vm61_vm4, %v60_v18, 0.0  ;;  %v28_v21 = vpop.permute.xlu0 %27  ;;  %v105_v26 = vsel %vm104_vm7, %v101_v19, 0.0 }
  0x86   :  { %v46_v22 = vadd.f32 %v45_v17, %v44_v16  ;;  %v63_v23 = vrot.slane %v62_v20, 4  ;;  %v76_v24 = vsel %vm75_vm5, %v28_v21, 0.0  ;;  %v95_v25 = vrot.slane %v28_v21, 7 }
  0x87   :  { %v78_v27 = vsel %vm77_vm6, %v76_v24, 0.0 }
  0x88   :  { %v47_v28 = vrot.slane %v46_v22, 2  ;;  %v64_v29 = vadd.f32 %v63_v23, %v62_v20  ;;  %v79_v30 = vrot.slane %v78_v27, 4  ;;  %v97_v31 = vsel %vm94_vm9, %v95_v25, %v96_v15 }
  0x89   :  { %v100_v32 = vsel %vm92_vm8, %v97_v31, 0.0 }
  0x8a   :  { %v48_v33 = vadd.f32 %v47_v28, %v46_v22  ;;  %v65_v34 = vrot.slane %v64_v29, 2  ;;  %v80_v35 = vadd.f32 %v79_v30, %v78_v27  ;;  %v103_v36 = vsel %vm102_vm10, %v100_v32, 0.0 }
  0x8b   :  { %v106_v37 = vadd.f32 %v105_v26, %v103_v36 }
  0x8c   :  { %v66_v38 = vadd.f32 %v65_v34, %v64_v29  ;;  %v81_v39 = vrot.slane %v80_v35, 2  ;;  %v49_v40 = vrot.slane %v48_v33, 1 }
  0x8d   :  { %v107_v41 = vrot.slane %v106_v37, 4 }
  0x8e   :  { %v67_v42 = vrot.slane %v66_v38, 1  ;;  %v82_v43 = vadd.f32 %v81_v39, %v80_v35  ;;  %v50_v47 = vadd.f32 %v49_v40, %v48_v33 }
  0x8f   :  { %v108_v44 = vadd.f32 %v107_v41, %v106_v37 }
  0x90   :  { %v68_v45 = vadd.f32 %v67_v42, %v66_v38  ;;  %v83_v46 = vrot.slane %v82_v43, 1 }
  0x91   :  { %v109_v48 = vrot.slane %v108_v44, 2 }
  0x92   :  { %v84_v49 = vadd.f32 %v83_v46, %v82_v43  ;;  %v69_v50 = vadd.f32 %v68_v45, %v50_v47 }
  0x93   :  { %v110_v51 = vadd.f32 %v109_v48, %v108_v44 }
  0x94   :  { %v85_v53 = vadd.f32 %v84_v49, %v69_v50 }
  0x95   :  { %v111_v52 = vrot.slane %v110_v51, 1 }
  0x97   :  { %v112_v54 = vadd.f32 %v111_v52, %v110_v51 }
  0x99   :  { %v113_v56 = vadd.f32 %v112_v54, %v85_v53 }
  0x9b   :  { %v115_v57 = vadd.f32 %v114_v55, %v113_v56 }
  0x9d   :  { %116 = vst.msk [vmem:[#allocation3] sm:$0x1] %vm104_vm7, %v115_v57 }
  0x9e   :  { %150 = shalt.err (!%p147_p4)
}
  0x9f   :  { %s151_s5 = scalar_lea.hbm %s226_s3, 16 }
  0xa0   :  { %p152_p5 = scmp.ne.s32.totalorder %s226_s3, %s151_s5  ;;  %p155_p6 = scmp.lt.u32.totalorder %s151_s5, %s226_s3 }
  0xa2   :  { %p157_p7 = pnand %p155_p6, %p152_p5 }
  0xa4   :  { %160 = shalt.err (!%p157_p7)
}
  0xa5   :  { %126 = dma.vmem_to_hbm [thread:$0]  %s124_s27, 16, %s226_s3, [#allocation4]  }
  0xa6   :  { %161 = dma.done.wait [#allocation4], 16  }
  0xa7   :  { %162 = vsyncadd [#allocation4], 4294967280 }
  0xa8   :  { %130 = vsyncpa [#allocation4], 1 }

</bundles_post_ra>
